<compile_context>
chip_gen: v7x
topology: tpu7x:2x2x1
jax: 0.10.0
libtpu: 0.0.40
codegen_flags: <defaults>
</compile_context>

<pallas_src>
import jax
import jax.numpy as jnp
from jax import lax
from jax.experimental import pallas as pl
from jax.experimental.pallas import tpu as pltpu

_LANES = 128
_INV_SQRT3 = 0.5773502691896258


def _round_up(x, m):
    return ((x + m - 1) // m) * m


def _is_multi_tensorcore():
    """True on chips with >1 TensorCore per device (v7x) -> core-parallel split."""
    try:
        kind = jax.devices()[0].device_kind.lower()
    except Exception:
        return False
    return ("v7" in kind) or ("7x" in kind)


def simple_ftp_forward(frac, weight, *, block_rows=None, n_splits=None):
    """frac: [N, 3], weight: [n_out]  ->  [n_out] float32.

    out[w] = (weight[w] / sqrt(3)) * sum_{n,i} frac[n, i]^2
    """
    n, d = frac.shape
    assert d == 3, "irreps_in1 = 1x1o has dim 3"
    n_out = weight.shape[0]

    # Stream f32 or bf16 directly; anything else is cast to f32.  Accumulate in f32.
    if frac.dtype not in (jnp.float32, jnp.bfloat16):
        frac = frac.astype(jnp.float32)
    row_align = 8 if frac.dtype == jnp.float32 else 16   # (8,128) f32 / (16,128) bf16

    multi_core = _is_multi_tensorcore()
    if n_splits is None:
        n_splits = 2 if multi_core else 1                # single-TC chips: no split
    if block_rows is None:
        block_rows = 4096 if multi_core else 2048        # 2 MiB / 1 MiB f32 tiles
    block_rows = max(16, _round_up(int(block_rows), 16))  # defensive tile rounding

    # ---- lane-dense slab: [N,3] -> [3N] -> [rows, 128]; no HBM pad when aligned ----
    x = frac.reshape(-1)
    total = x.shape[0]
    align = row_align * _LANES
    pad = (-total) % align
    if pad:
        # Fallback only for unaligned flattened lengths (<= align-1 zeros, exact for
        # a sum of squares).  Tile/split raggedness is handled by in-kernel masking,
        # never by padding.
        x = jnp.pad(x, (0, pad))
    rows = (total + pad) // _LANES
    x2d = x.reshape(rows, _LANES)

    tile_rows = rows if rows <= block_rows else block_rows
    steps_total = pl.cdiv(rows, tile_rows)
    n_splits = max(1, min(int(n_splits), steps_total))
    spp = pl.cdiv(steps_total, n_splits)                  # grid steps per split
    last_block = steps_total - 1
    groups = tile_rows // 8                               # (8,128) vregs per tile

    def x_index_map(s, i):
        # Overflow steps of an uneven split are clamped onto the last real block;
        # the kernel masks them out entirely via the *unclamped* row offset.
        return (jnp.minimum(s * spp + i, last_block), 0)

    def kernel(x_ref, out_ref, acc_ref):
        s = pl.program_id(0)
        i = pl.program_id(1)

        @pl.when(i == 0)
        def _():
            acc_ref[...] = jnp.zeros_like(acc_ref)

        x_tile = x_ref[...].astype(jnp.float32)
        sq = x_tile * x_tile
        row0 = (s * spp + i) * tile_rows                  # unclamped global row offset

        # Hot path: full tile -> pure VALU vreg adds into the (8,128) accumulator.
        @pl.when(row0 + tile_rows <= rows)
        def _():
            acc_ref[...] += jnp.sum(sq.reshape(groups, 8, _LANES), axis=0)

        # Boundary / overflow tile: mask rows past the end of the slab.
        @pl.when(row0 + tile_rows > rows)
        def _():
            rid = row0 + lax.broadcasted_iota(jnp.int32, (tile_rows, _LANES), 0)
            msq = jnp.where(rid < rows, sq, 0.0)
            acc_ref[...] += jnp.sum(msq.reshape(groups, 8, _LANES), axis=0)

        # Finalize: emit the raw (8,128) vector partial; cross-lane reduce and the
        # weight scale happen once in the wrapper (no XLU work in the kernel).
        @pl.when(i == spp - 1)
        def _():
            out_ref[0] = acc_ref[...]

    # Deeper pipelining on the input stream (compute per tile is trivial).
    if spp >= 3 and hasattr(pl, "Buffered"):
        try:
            x_spec = pl.BlockSpec((tile_rows, _LANES), x_index_map,
                                  pipeline_mode=pl.Buffered(3))
        except TypeError:
            x_spec = pl.BlockSpec((tile_rows, _LANES), x_index_map)
    else:
        x_spec = pl.BlockSpec((tile_rows, _LANES), x_index_map)

    if n_splits > 1 and multi_core:
        dim_sem = (getattr(pltpu, "CORE_PARALLEL", "parallel"),
                   getattr(pltpu, "ARBITRARY", "arbitrary"))
    else:
        dim_sem = ("arbitrary", "arbitrary")

    partial = pl.pallas_call(
        kernel,
        out_shape=jax.ShapeDtypeStruct((n_splits, 8, _LANES), jnp.float32),
        grid_spec=pltpu.PrefetchScalarGridSpec(
            num_scalar_prefetch=0,
            grid=(n_splits, spp),                          # reduction axis last
            in_specs=[x_spec],
            out_specs=pl.BlockSpec((1, 8, _LANES), lambda s, i: (s, 0, 0)),
            scratch_shapes=[pltpu.VMEM((8, _LANES), jnp.float32)],
        ),
        compiler_params=pltpu.CompilerParams(dimension_semantics=dim_sem),
    )(x2d)

    # Reduce <= n_splits vregs and apply the folded w3j(1,1,0)=I/sqrt(3) weight scale.
    sum_sq = jnp.sum(partial)
    return sum_sq * (weight.astype(jnp.float32) * jnp.float32(_INV_SQRT3))


def _reference(frac, weight):
    """Pure-JAX reference of the same math."""
    w3j = jnp.eye(3, dtype=jnp.float32) * jnp.float32(_INV_SQRT3)
    f = frac.astype(jnp.float32)
    s = jnp.einsum("ni,ij,nj->n", f, w3j, f)
    return jnp.sum(s[:, None] * weight.astype(jnp.float32)[None, :], axis=0)


if __name__ == "__main__":
    key = jax.random.PRNGKey(0)
    k_x, k_w = jax.random.split(key)
    weight = jax.random.normal(k_w, (10,), dtype=jnp.float32)

    # 1) tiny batch consistent with the module: 8 vectors of a 1o irrep.
    frac = jax.random.normal(k_x, (8, 3), dtype=jnp.float32)
    out = jax.block_until_ready(simple_ftp_forward(frac, weight))
    ref = _reference(frac, weight)
    assert out.shape == (10,)
    assert jnp.allclose(out, ref, rtol=1e-5, atol=1e-5), (out, ref)

    # 2) larger aligned batch with tiny tiles: multi-step grid accumulation plus the
    #    masked partial last block (rows=72, tile=16), pad-free path.
    frac2 = jax.random.normal(k_x, (3072, 3), dtype=jnp.float32)
    ref2 = _reference(frac2, weight)
    out2 = jax.block_until_ready(simple_ftp_forward(frac2, weight, block_rows=16))
    assert jnp.allclose(out2, ref2, rtol=5e-4, atol=1e-2), (out2, ref2)

    # 3) forced 2-way split: exercises the clamped, fully-masked overflow block on any
    #    chip (core-parallel on v7x, plain sequential elsewhere).
    out3 = jax.block_until_ready(
        simple_ftp_forward(frac2, weight, block_rows=16, n_splits=2))
    assert jnp.allclose(out3, ref2, rtol=5e-4, atol=1e-2), (out3, ref2)

    # 4) unaligned batch: minimal zero-pad fallback path.
    frac4 = jax.random.normal(k_x, (100, 3), dtype=jnp.float32)
    out4 = jax.block_until_ready(simple_ftp_forward(frac4, weight))
    assert jnp.allclose(out4, _reference(frac4, weight), rtol=1e-5, atol=1e-4), out4

    # 5) bf16 input (halved HBM bytes), f32 accumulation in-kernel.
    out5 = jax.block_until_ready(
        simple_ftp_forward(frac2.astype(jnp.bfloat16), weight))
    assert jnp.allclose(out5, ref2, rtol=3e-2, atol=1e-1), (out5, ref2)

    print("KERNEL_OK")
</pallas_src>

<mosaic_0001>
module attributes {stable_mosaic.version = 11 : i64} {
  func.func @kernel(%arg0: i32, %arg1: i32, %arg2: memref<8x128xf32, #tpu.memory_space<vmem>>, %arg3: memref<1x8x128xf32, #tpu.memory_space<vmem>>, %arg4: memref<8x128xf32, #tpu.memory_space<vmem>>) attributes {dimension_semantics = [#tpu.dimension_semantics<arbitrary>, #tpu.dimension_semantics<arbitrary>], iteration_bounds = array<i64: 1, 1>, scalar_prefetch = 0 : i64, scratch_operands = 1 : i64, tpu.core_type = #tpu.core_type<tc>, window_params = [{transform_indices = @transform_0, window_bounds = array<i64: 8, 128>}, {transform_indices = @transform_1, window_bounds = array<i64: 1, 8, 128>}]} {
    %c0_i32 = arith.constant 0 : i32
    %0 = arith.cmpi eq, %arg1, %c0_i32 : i32
    %1 = arith.extui %0 : i1 to i32
    %c0_i32_0 = arith.constant 0 : i32
    %2 = arith.cmpi ne, %1, %c0_i32_0 : i32
    scf.if %2 {
      %cst = arith.constant 0.000000e+00 : f32
      %19 = vector.broadcast %cst : f32 to vector<8x128xf32>
      %c0_10 = arith.constant 0 : index
      %c0_11 = arith.constant 0 : index
      %20 = vector.load %arg4[%c0_10, %c0_11] : memref<8x128xf32, #tpu.memory_space<vmem>>, vector<8x128xf32>
      tpu.vector_store %arg4[%c0_10, %c0_11], %19 {strides = array<i32>} : memref<8x128xf32, #tpu.memory_space<vmem>>, vector<8x128xf32>,
    } else {
    }
    %c0 = arith.constant 0 : index
    %c0_1 = arith.constant 0 : index
    %3 = vector.load %arg2[%c0, %c0_1] : memref<8x128xf32, #tpu.memory_space<vmem>>, vector<8x128xf32>
    %4 = arith.mulf %3, %3 : vector<8x128xf32>
    %c1_i32 = arith.constant 1 : i32
    %5 = arith.muli %arg0, %c1_i32 : i32
    %6 = arith.addi %5, %arg1 : i32
    %c8_i32 = arith.constant 8 : i32
    %7 = arith.muli %6, %c8_i32 : i32
    %c8_i32_2 = arith.constant 8 : i32
    %8 = arith.addi %7, %c8_i32_2 : i32
    %c8_i32_3 = arith.constant 8 : i32
    %9 = arith.cmpi sle, %8, %c8_i32_3 : i32
    %10 = arith.extui %9 : i1 to i32
    %c0_i32_4 = arith.constant 0 : i32
    %11 = arith.cmpi ne, %10, %c0_i32_4 : i32
    scf.if %11 {
      %c0_10 = arith.constant 0 : index
      %c0_11 = arith.constant 0 : index
      %19 = vector.load %arg4[%c0_10, %c0_11] : memref<8x128xf32, #tpu.memory_space<vmem>>, vector<8x128xf32>
      %20 = vector.shape_cast %4 : vector<8x128xf32> to vector<1x8x128xf32>
      %cst = arith.constant dense<0.000000e+00> : vector<8x128xf32>
      %21 = vector.multi_reduction <add>, %20, %cst [0] : vector<1x8x128xf32> to vector<8x128xf32>
      %22 = arith.addf %19, %21 : vector<8x128xf32>
      %c0_12 = arith.constant 0 : index
      %c0_13 = arith.constant 0 : index
      %23 = vector.load %arg4[%c0_12, %c0_13] : memref<8x128xf32, #tpu.memory_space<vmem>>, vector<8x128xf32>
      tpu.vector_store %arg4[%c0_12, %c0_13], %22 {strides = array<i32>} : memref<8x128xf32, #tpu.memory_space<vmem>>, vector<8x128xf32>,
    } else {
    }
    %c8_i32_5 = arith.constant 8 : i32
    %12 = arith.addi %7, %c8_i32_5 : i32
    %c8_i32_6 = arith.constant 8 : i32
    %13 = arith.cmpi sgt, %12, %c8_i32_6 : i32
    %14 = arith.extui %13 : i1 to i32
    %c0_i32_7 = arith.constant 0 : i32
    %15 = arith.cmpi ne, %14, %c0_i32_7 : i32
    scf.if %15 {
      %19 = tpu.iota {dimensions = array<i32: 0>} : vector<8x128xi32>
      %20 = vector.broadcast %7 : i32 to vector<8x128xi32>
      %21 = arith.addi %20, %19 : vector<8x128xi32>
      %c8_i32_10 = arith.constant 8 : i32
      %22 = vector.broadcast %c8_i32_10 : i32 to vector<8x128xi32>
      %23 = arith.cmpi slt, %21, %22 : vector<8x128xi32>
      %cst = arith.constant 0.000000e+00 : f32
      %24 = vector.broadcast %cst : f32 to vector<8x128xf32>
      %25 = arith.select %23, %4, %24 : vector<8x128xi1>, vector<8x128xf32>
      %c0_11 = arith.constant 0 : index
      %c0_12 = arith.constant 0 : index
      %26 = vector.load %arg4[%c0_11, %c0_12] : memref<8x128xf32, #tpu.memory_space<vmem>>, vector<8x128xf32>
      %27 = vector.shape_cast %25 : vector<8x128xf32> to vector<1x8x128xf32>
      %cst_13 = arith.constant dense<0.000000e+00> : vector<8x128xf32>
      %28 = vector.multi_reduction <add>, %27, %cst_13 [0] : vector<1x8x128xf32> to vector<8x128xf32>
      %29 = arith.addf %26, %28 : vector<8x128xf32>
      %c0_14 = arith.constant 0 : index
      %c0_15 = arith.constant 0 : index
      %30 = vector.load %arg4[%c0_14, %c0_15] : memref<8x128xf32, #tpu.memory_space<vmem>>, vector<8x128xf32>
      tpu.vector_store %arg4[%c0_14, %c0_15], %29 {strides = array<i32>} : memref<8x128xf32, #tpu.memory_space<vmem>>, vector<8x128xf32>,
    } else {
    }
    %c0_i32_8 = arith.constant 0 : i32
    %16 = arith.cmpi eq, %arg1, %c0_i32_8 : i32
    %17 = arith.extui %16 : i1 to i32
    %c0_i32_9 = arith.constant 0 : i32
    %18 = arith.cmpi ne, %17, %c0_i32_9 : i32
    scf.if %18 {
      %c0_10 = arith.constant 0 : index
      %c0_11 = arith.constant 0 : index
      %19 = vector.load %arg4[%c0_10, %c0_11] : memref<8x128xf32, #tpu.memory_space<vmem>>, vector<8x128xf32>
      %c0_12 = arith.constant 0 : index
      %c0_13 = arith.constant 0 : index
      %c0_14 = arith.constant 0 : index
      %20 = vector.load %arg3[%c0_12, %c0_13, %c0_14] : memref<1x8x128xf32, #tpu.memory_space<vmem>>, vector<1x8x128xf32>
      %21 = vector.shape_cast %20 : vector<1x8x128xf32> to vector<8x128xf32>
      %22 = vector.shape_cast %19 : vector<8x128xf32> to vector<1x8x128xf32>
      tpu.vector_store %arg3[%c0_12, %c0_13, %c0_14], %22 {strides = array<i32>} : memref<1x8x128xf32, #tpu.memory_space<vmem>>, vector<1x8x128xf32>,
    } else {
    }
    return
  }
  func.func @transform_0(%arg0: i32, %arg1: i32) -> (i32, i32) {
    %c1_i32 = arith.constant 1 : i32
    %0 = arith.muli %arg0, %c1_i32 : i32
    %1 = arith.addi %0, %arg1 : i32
    %c0_i32 = arith.constant 0 : i32
    %2 = arith.minsi %1, %c0_i32 : i32
    %c0_i32_0 = arith.constant 0 : i32
    %c0_i32_1 = arith.constant 0 : i32
    return %2, %c0_i32_0 : i32, i32
  }
  func.func @transform_1(%arg0: i32, %arg1: i32) -> (i32, i32, i32) {
    %c0_i32 = arith.constant 0 : i32
    %c0_i32_0 = arith.constant 0 : i32
    %c0_i32_1 = arith.constant 0 : i32
    return %arg0, %c0_i32, %c0_i32_0 : i32, i32, i32
  }
}

</mosaic_0001>

<bundles_post_ra>
// kernel: tpu_custom_call.1
= control target key start
LH: loop header
LB: loop body
LE: loop exit
PB: predicated region body
PF: predicated region fallthrough
CT: control target
= control target key end

     0   :  { %6 = vsyncpa [#allocation4], 0  ;;  %s169_s0 = inlined_call_operand.hbm [shape: f32[8,128], index: 0, kind: input, shape index: {}]   ;;  %s170_s1 = inlined_call_operand.hbm [shape: f32[1,8,128], index: 1, kind: output, shape index: {}]  }
   0x1   :  { %7 = vsyncpa [#allocation5], 0  ;;  %s133_s6 = smov [#allocation3]   ;;  %s85_s10 = scalar_lea.hbm %s169_s0, 128 }
   0x2   :  { %s19_s7 = sshll.u32 %s133_s6, 4  ;;  %p86_p0 = scmp.ne.s32.totalorder %s169_s0, %s85_s10  ;;  %s20_s7 = int_to_ptr.vmem [resolvable:$true] %s19_s7 }
   0x3   :  { %p89_p1 = scmp.lt.u32.totalorder %s85_s10, %s169_s0 }
   0x5   :  { %p91_p2 = pnand %p89_p1, %p86_p0 }
   0x7   :  { %94 = shalt.err (!%p91_p2)
}
   0x8   :  { %s95_s15 = scalar_lea.vmem %s20_s7, 128  ;;  %p100_p4 = scmp.lt.s32.totalorder %s20_s7, %s20_s7 }
   0x9   :  { %p96_p3 = scmp.ne.s32.totalorder %s20_s7, %s95_s15  ;;  %p101_p5 = scmp.lt.s32.totalorder %s95_s15, %s95_s15 }
   0xb   :  { %p102_p6 = por %p101_p5, %p100_p4 }
   0xd   :  { %p103_p7 = pnand %p102_p6, %p96_p3 }
   0xf   :  { %106 = shalt.err (!%p103_p7)
}
  0x10   :  { %22 = dma.hbm_to_vmem [thread:$0]  %s169_s0, 128, %s20_s7, [#allocation4]  }
  0x11   :  { %129 = dma.done.wait [#allocation4], 128  }
  0x12   :  { %130 = vsyncadd [#allocation4], 4294967168  ;;  %s134_s18 = smov [#allocation6]   ;;  %v34_v0 = vld [vmem:[#allocation3] sm:$0xff] }
  0x13   :  { %s72_s19 = sshll.u32 %s134_s18, 4  ;;  %v35_v1 = vmul.f32 %v34_v0, %v34_v0  ;;  %s73_s19 = int_to_ptr.vmem [resolvable:$true] %s72_s19 }
  0x14   :  { %s107_s20 = scalar_lea.vmem %s73_s19, 128  ;;  %p112_p9 = scmp.lt.s32.totalorder %s73_s19, %s73_s19 }
  0x15   :  { %65 = vst [vmem:[#allocation6] sm:$0xff] %v35_v1  ;;  %p108_p8 = scmp.ne.s32.totalorder %s73_s19, %s107_s20  ;;  %p113_p10 = scmp.lt.s32.totalorder %s107_s20, %s107_s20 }
  0x17   :  { %p114_p11 = por %p113_p10, %p112_p9 }
  0x19   :  { %p115_p12 = pnand %p114_p11, %p108_p8 }
  0x1b   :  { %118 = shalt.err (!%p115_p12)
}
  0x1c   :  { %s119_s23 = scalar_lea.hbm %s170_s1, 128 }
  0x1d   :  { %p120_p13 = scmp.ne.s32.totalorder %s170_s1, %s119_s23  ;;  %p123_p0 = scmp.lt.u32.totalorder %s119_s23, %s170_s1 }
  0x1f   :  { %p125_p1 = pnand %p123_p0, %p120_p13 }
  0x21   :  { %128 = shalt.err (!%p125_p1)
}
  0x22   :  { %75 = dma.vmem_to_hbm [thread:$0]  %s73_s19, 128, %s170_s1, [#allocation5]  }
  0x23   :  { %131 = dma.done.wait [#allocation5], 128  }
  0x24   :  { %132 = vsyncadd [#allocation5], 4294967168 }
  0x25   :  { %79 = vsyncpa [#allocation4], 1 }
  0x26   :  { %80 = vsyncpa [#allocation5], 1 }

</bundles_post_ra>
